<compile_context>
chip_gen: v5e
topology: v5e:2x2
jax: 0.10.0
libtpu: 0.0.40
codegen_flags: <defaults>
</compile_context>

<pallas_src>
import jax
import jax.numpy as jnp
from jax.experimental import pallas as pl
from jax.experimental.pallas import tpu as pltpu


H_DIM = 16


def _mlp_kernel(xT_ref,
                w1_ref, b1_ref,
                w2_ref, b2_ref,
                w3_ref, b3_ref,
                w4_ref, b4_ref,
                o_ref):
    # xT_ref: [D_in, B_tile]  (batch on the lane axis)
    # w*_ref: [out, in]       (PyTorch Linear weight layout)
    # b*_ref: [out, 1]        (broadcast along lanes)
    x = xT_ref[...]

    h = jnp.tanh(
        jnp.dot(w1_ref[...], x, preferred_element_type=jnp.float32) + b1_ref[...])
    h = jnp.tanh(
        jnp.dot(w2_ref[...], h, preferred_element_type=jnp.float32) + b2_ref[...])
    h = jnp.tanh(
        jnp.dot(w3_ref[...], h, preferred_element_type=jnp.float32) + b3_ref[...])
    out = jnp.dot(w4_ref[...], h, preferred_element_type=jnp.float32) + b4_ref[...]

    o_ref[...] = out.astype(o_ref.dtype)  # [1, B_tile], lane-dense store


def penalty_model_forward(sazg, params, *, b_tile=512):
    """PenaltyModel MLP forward pass as a single batched Pallas kernel.

    sazg:   [B, s_dim + a_dim + 3*z_dim] float32
    params: dict with w1..w4 of shape [out, in] and b1..b4 of shape [out, 1]
    returns [B, 1] float32  (matches the PyTorch module's output shape)
    """
    B, d_in = sazg.shape

    # Pad batch up to a multiple of the tile so every block is (D_in, b_tile)
    # with the lane axis a multiple of 128.
    n_tiles = pl.cdiv(B, b_tile)
    B_pad = n_tiles * b_tile

    xT = sazg.T  # [D_in, B] -- batch on the lane axis
    if B_pad != B:
        xT = jnp.pad(xT, ((0, 0), (0, B_pad - B)))

    w1, b1 = params["w1"], params["b1"]
    w2, b2 = params["w2"], params["b2"]
    w3, b3 = params["w3"], params["b3"]
    w4, b4 = params["w4"], params["b4"]

    # Weights/biases: full-array blocks with a constant index_map -> DMA'd once,
    # resident in VMEM for the whole call.  Input/output: tiled along batch.
    def resident(a):
        return pl.BlockSpec(a.shape, lambda i: (0, 0))

    in_specs = [
        pl.BlockSpec((d_in, b_tile), lambda i: (0, i)),   # xT batch tiles
        resident(w1), resident(b1),
        resident(w2), resident(b2),
        resident(w3), resident(b3),
        resident(w4), resident(b4),
    ]
    out_specs = pl.BlockSpec((1, b_tile), lambda i: (0, i))  # lane-dense [1, B_tile]

    outT = pl.pallas_call(
        _mlp_kernel,
        out_shape=jax.ShapeDtypeStruct((1, B_pad), jnp.float32),
        grid=(n_tiles,),
        in_specs=in_specs,
        out_specs=out_specs,
        compiler_params=pltpu.CompilerParams(
            dimension_semantics=("parallel",)),  # v7x dual-TC sharding; no-op on v5e/v6e
    )(xT, w1, b1, w2, b2, w3, b3, w4, b4)

    # Back to the module's [B, 1] output layout.
    return outT[0, :B].reshape(B, 1)


def init_params(key, in_dim, h_dim=H_DIM):
    """PyTorch-Linear-like init: U[-1/sqrt(fan_in), 1/sqrt(fan_in)].

    Weights are stored [out, in] (same as torch.nn.Linear.weight), biases [out, 1].
    """
    dims = [(in_dim, h_dim), (h_dim, h_dim), (h_dim, h_dim), (h_dim, 1)]
    params = {}
    for i, (fan_in, fan_out) in enumerate(dims, start=1):
        key, kw, kb = jax.random.split(key, 3)
        bound = 1.0 / jnp.sqrt(jnp.float32(fan_in))
        params[f"w{i}"] = jax.random.uniform(
            kw, (fan_out, fan_in), jnp.float32, minval=-bound, maxval=bound)
        params[f"b{i}"] = jax.random.uniform(
            kb, (fan_out, 1), jnp.float32, minval=-bound, maxval=bound)
    return params


def reference_forward(sazg, params):
    """Pure-JAX reference in the standard [B, D] layout (PyTorch semantics)."""
    h = jnp.tanh(sazg @ params["w1"].T + params["b1"].T)
    h = jnp.tanh(h @ params["w2"].T + params["b2"].T)
    h = jnp.tanh(h @ params["w3"].T + params["b3"].T)
    return h @ params["w4"].T + params["b4"].T


if __name__ == "__main__":
    # Shapes consistent with the module: s_dim=4, a_dim=2, z_dim=2 -> D_in=12.
    # Batch of 1024 (two 512-wide tiles) so the lane axis is actually filled;
    # at B~8 this kernel would be pure launch overhead (see perf notes).
    s_dim, a_dim, z_dim = 4, 2, 2
    in_dim = s_dim + a_dim + 3 * z_dim  # = 12
    batch = 1024

    key = jax.random.PRNGKey(0)
    key_x, key_p = jax.random.split(key)
    sazg = jax.random.normal(key_x, (batch, in_dim), dtype=jnp.float32)
    params = init_params(key_p, in_dim)

    out = penalty_model_forward(sazg, params, b_tile=512)
    out = jax.block_until_ready(out)

    ref = reference_forward(sazg, params)
    assert out.shape == (batch, 1)
    assert jnp.allclose(out, ref, atol=1e-5, rtol=1e-5)

    print("KERNEL_OK")
</pallas_src>

<mosaic_0001>
module attributes {stable_mosaic.version = 11 : i64} {
  func.func @_mlp_kernel(%arg0: i32, %arg1: memref<12x512xf32, #tpu.memory_space<vmem>>, %arg2: memref<16x12xf32, #tpu.memory_space<vmem>>, %arg3: memref<16x1xf32, #tpu.memory_space<vmem>>, %arg4: memref<16x16xf32, #tpu.memory_space<vmem>>, %arg5: memref<16x1xf32, #tpu.memory_space<vmem>>, %arg6: memref<16x16xf32, #tpu.memory_space<vmem>>, %arg7: memref<16x1xf32, #tpu.memory_space<vmem>>, %arg8: memref<1x16xf32, #tpu.memory_space<vmem>>, %arg9: memref<1x1xf32, #tpu.memory_space<vmem>>, %arg10: memref<1x512xf32, #tpu.memory_space<vmem>>) attributes {dimension_semantics = [#tpu.dimension_semantics<parallel>], iteration_bounds = array<i64: 2>, scalar_prefetch = 0 : i64, scratch_operands = 0 : i64, tpu.core_type = #tpu.core_type<tc>, window_params = [{transform_indices = @transform_0, window_bounds = array<i64: 12, 512>}, {pipeline_mode = #tpu.pipeline_mode<synchronous>, transform_indices = @transform_1, window_bounds = array<i64: 16, 12>}, {pipeline_mode = #tpu.pipeline_mode<synchronous>, transform_indices = @transform_2, window_bounds = array<i64: 16, 1>}, {pipeline_mode = #tpu.pipeline_mode<synchronous>, transform_indices = @transform_3, window_bounds = array<i64: 16, 16>}, {pipeline_mode = #tpu.pipeline_mode<synchronous>, transform_indices = @transform_4, window_bounds = array<i64: 16, 1>}, {pipeline_mode = #tpu.pipeline_mode<synchronous>, transform_indices = @transform_5, window_bounds = array<i64: 16, 16>}, {pipeline_mode = #tpu.pipeline_mode<synchronous>, transform_indices = @transform_6, window_bounds = array<i64: 16, 1>}, {pipeline_mode = #tpu.pipeline_mode<synchronous>, transform_indices = @transform_7, window_bounds = array<i64: 1, 16>}, {pipeline_mode = #tpu.pipeline_mode<synchronous>, transform_indices = @transform_8, window_bounds = array<i64: 1, 1>}, {transform_indices = @transform_9, window_bounds = array<i64: 1, 512>}]} {
    %c0 = arith.constant 0 : index
    %c0_0 = arith.constant 0 : index
    %0 = vector.load %arg1[%c0, %c0_0] : memref<12x512xf32, #tpu.memory_space<vmem>>, vector<12x512xf32>
    %c0_1 = arith.constant 0 : index
    %c0_2 = arith.constant 0 : index
    %1 = vector.load %arg2[%c0_1, %c0_2] : memref<16x12xf32, #tpu.memory_space<vmem>>, vector<16x12xf32>
    %cst = arith.constant dense<0.000000e+00> : vector<16x512xf32>
    %2 = tpu.matmul %1, %0, %cst {dimension_numbers = #tpu.dot_dimension_numbers<[1], [0], [0], [1], [0, 0, 1, 1], [], []>} : vector<16x12xf32>, vector<12x512xf32>, vector<16x512xf32> -> vector<16x512xf32>
    %c0_3 = arith.constant 0 : index
    %c0_4 = arith.constant 0 : index
    %3 = vector.load %arg3[%c0_3, %c0_4] : memref<16x1xf32, #tpu.memory_space<vmem>>, vector<16x1xf32>
    %4 = vector.broadcast %3 : vector<16x1xf32> to vector<16x512xf32>
    %5 = arith.addf %2, %4 : vector<16x512xf32>
    %6 = math.tanh %5 : vector<16x512xf32>
    %c0_5 = arith.constant 0 : index
    %c0_6 = arith.constant 0 : index
    %7 = vector.load %arg4[%c0_5, %c0_6] : memref<16x16xf32, #tpu.memory_space<vmem>>, vector<16x16xf32>
    %cst_7 = arith.constant dense<0.000000e+00> : vector<16x512xf32>
    %8 = tpu.matmul %7, %6, %cst_7 {dimension_numbers = #tpu.dot_dimension_numbers<[1], [0], [0], [1], [0, 0, 1, 1], [], []>} : vector<16x16xf32>, vector<16x512xf32>, vector<16x512xf32> -> vector<16x512xf32>
    %c0_8 = arith.constant 0 : index
    %c0_9 = arith.constant 0 : index
    %9 = vector.load %arg5[%c0_8, %c0_9] : memref<16x1xf32, #tpu.memory_space<vmem>>, vector<16x1xf32>
    %10 = vector.broadcast %9 : vector<16x1xf32> to vector<16x512xf32>
    %11 = arith.addf %8, %10 : vector<16x512xf32>
    %12 = math.tanh %11 : vector<16x512xf32>
    %c0_10 = arith.constant 0 : index
    %c0_11 = arith.constant 0 : index
    %13 = vector.load %arg6[%c0_10, %c0_11] : memref<16x16xf32, #tpu.memory_space<vmem>>, vector<16x16xf32>
    %cst_12 = arith.constant dense<0.000000e+00> : vector<16x512xf32>
    %14 = tpu.matmul %13, %12, %cst_12 {dimension_numbers = #tpu.dot_dimension_numbers<[1], [0], [0], [1], [0, 0, 1, 1], [], []>} : vector<16x16xf32>, vector<16x512xf32>, vector<16x512xf32> -> vector<16x512xf32>
    %c0_13 = arith.constant 0 : index
    %c0_14 = arith.constant 0 : index
    %15 = vector.load %arg7[%c0_13, %c0_14] : memref<16x1xf32, #tpu.memory_space<vmem>>, vector<16x1xf32>
    %16 = vector.broadcast %15 : vector<16x1xf32> to vector<16x512xf32>
    %17 = arith.addf %14, %16 : vector<16x512xf32>
    %18 = math.tanh %17 : vector<16x512xf32>
    %c0_15 = arith.constant 0 : index
    %c0_16 = arith.constant 0 : index
    %19 = vector.load %arg8[%c0_15, %c0_16] : memref<1x16xf32, #tpu.memory_space<vmem>>, vector<1x16xf32>
    %cst_17 = arith.constant dense<0.000000e+00> : vector<1x512xf32>
    %20 = tpu.matmul %19, %18, %cst_17 {dimension_numbers = #tpu.dot_dimension_numbers<[1], [0], [0], [1], [0, 0, 1, 1], [], []>} : vector<1x16xf32>, vector<16x512xf32>, vector<1x512xf32> -> vector<1x512xf32>
    %c0_18 = arith.constant 0 : index
    %c0_19 = arith.constant 0 : index
    %21 = vector.load %arg9[%c0_18, %c0_19] : memref<1x1xf32, #tpu.memory_space<vmem>>, vector<1x1xf32>
    %22 = vector.broadcast %21 : vector<1x1xf32> to vector<1x512xf32>
    %23 = arith.addf %20, %22 : vector<1x512xf32>
    %c0_20 = arith.constant 0 : index
    %c0_21 = arith.constant 0 : index
    %24 = vector.load %arg10[%c0_20, %c0_21] : memref<1x512xf32, #tpu.memory_space<vmem>>, vector<1x512xf32>
    tpu.vector_store %arg10[%c0_20, %c0_21], %23 {strides = array<i32>} : memref<1x512xf32, #tpu.memory_space<vmem>>, vector<1x512xf32>,
    return
  }
  func.func @transform_0(%arg0: i32) -> (i32, i32) {
    %c0_i32 = arith.constant 0 : i32
    %c0_i32_0 = arith.constant 0 : i32
    return %c0_i32, %arg0 : i32, i32
  }
  func.func @transform_1(%arg0: i32) -> (i32, i32) {
    %c0_i32 = arith.constant 0 : i32
    %c0_i32_0 = arith.constant 0 : i32
    %c0_i32_1 = arith.constant 0 : i32
    return %c0_i32, %c0_i32_0 : i32, i32
  }
  func.func @transform_2(%arg0: i32) -> (i32, i32) {
    %c0_i32 = arith.constant 0 : i32
    %c0_i32_0 = arith.constant 0 : i32
    %c0_i32_1 = arith.constant 0 : i32
    return %c0_i32, %c0_i32_0 : i32, i32
  }
  func.func @transform_3(%arg0: i32) -> (i32, i32) {
    %c0_i32 = arith.constant 0 : i32
    %c0_i32_0 = arith.constant 0 : i32
    %c0_i32_1 = arith.constant 0 : i32
    return %c0_i32, %c0_i32_0 : i32, i32
  }
  func.func @transform_4(%arg0: i32) -> (i32, i32) {
    %c0_i32 = arith.constant 0 : i32
    %c0_i32_0 = arith.constant 0 : i32
    %c0_i32_1 = arith.constant 0 : i32
    return %c0_i32, %c0_i32_0 : i32, i32
  }
  func.func @transform_5(%arg0: i32) -> (i32, i32) {
    %c0_i32 = arith.constant 0 : i32
    %c0_i32_0 = arith.constant 0 : i32
    %c0_i32_1 = arith.constant 0 : i32
    return %c0_i32, %c0_i32_0 : i32, i32
  }
  func.func @transform_6(%arg0: i32) -> (i32, i32) {
    %c0_i32 = arith.constant 0 : i32
    %c0_i32_0 = arith.constant 0 : i32
    %c0_i32_1 = arith.constant 0 : i32
    return %c0_i32, %c0_i32_0 : i32, i32
  }
  func.func @transform_7(%arg0: i32) -> (i32, i32) {
    %c0_i32 = arith.constant 0 : i32
    %c0_i32_0 = arith.constant 0 : i32
    %c0_i32_1 = arith.constant 0 : i32
    return %c0_i32, %c0_i32_0 : i32, i32
  }
  func.func @transform_8(%arg0: i32) -> (i32, i32) {
    %c0_i32 = arith.constant 0 : i32
    %c0_i32_0 = arith.constant 0 : i32
    %c0_i32_1 = arith.constant 0 : i32
    return %c0_i32, %c0_i32_0 : i32, i32
  }
  func.func @transform_9(%arg0: i32) -> (i32, i32) {
    %c0_i32 = arith.constant 0 : i32
    %c0_i32_0 = arith.constant 0 : i32
    return %c0_i32, %arg0 : i32, i32
  }
}

</mosaic_0001>

<bundles_post_ra>
// kernel: tpu_custom_call.1
= control target key start
LH: loop header
LB: loop body
LE: loop exit
PB: predicated region body
PF: predicated region fallthrough
CT: control target
= control target key end

     0   :  { %s1431_s0 = inlined_call_operand.hbm [shape: f32[12,1024], index: 0, kind: input, shape index: {}]   ;;  %s1432_s1 = inlined_call_operand.vmem [shape: f32[16,12], index: 1, kind: input, shape index: {}]   ;;  %s1433_s2 = inlined_call_operand.vmem [shape: f32[16,1], index: 2, kind: input, shape index: {}]   ;;  %s1434_s3 = inlined_call_operand.vmem [shape: f32[16,16], index: 3, kind: input, shape index: {}]   ;;  %s1435_s4 = inlined_call_operand.vmem [shape: f32[16,1], index: 4, kind: input, shape index: {}]   ;;  %s1436_s5 = inlined_call_operand.vmem [shape: f32[16,16], index: 5, kind: input, shape index: {}]   ;;  %s1437_s6 = inlined_call_operand.vmem [shape: f32[16,1], index: 6, kind: input, shape index: {}]   ;;  %s1438_s7 = inlined_call_operand.vmem [shape: f32[1,16], index: 7, kind: input, shape index: {}]   ;;  %s1439_s8 = inlined_call_operand.<no memory space> [shape: f32[1,1], index: 8, kind: input, shape index: {}]   ;;  %s1440_s9 = inlined_call_operand.hbm [shape: f32[1,1024], index: 9, kind: output, shape index: {}]  }
   0x1   :  { %v14_v0 = vstv %s1439_s8 }
   0x2   :  { %15 = vst [vmem:[#allocation2] sm:$0x1] %v14_v0 }
   0x3   :  { %16 = vsyncpa [#allocation4], 0 }
   0x4   :  { %18 = vsyncpa [#allocation4 + $0x1], 0 }
   0x5   :  { %19 = vsyncpa [#allocation5], 0 }
   0x6   :  { %21 = vsyncpa [#allocation5 + $0x1], 0  ;;  %s1238_s11 = smov 0   ;;  %s1240_s12 = smov 0  }
   0x7   :  { %s1242_s13 = smov 0   ;;  %s1244_s14 = smov 0  }
   0x8 LB: > { %1442 = sst [smem:[#allocation9_spill]] %s1175_s13  ;;  %s1259_s8 = sadd.s32 4294967295, %s1179_s14   ;;  %s1179_s14 = sphi %s1244_s14, %s1453_s14   ;;  %s1175_s13 = sphi %s1242_s13, %s1450_s13   ;;  %s1171_s12 = sphi %s1240_s12, %s1452_s12   ;;  %s1167_s11 = sphi %s1238_s11, %s1451_s11  }
   0x9   : > { %s936_s15 = sadd.s32 4294967294, %s1179_s14   ;;  %s1263_s16 = sadd.s32 1, %s1179_s14  }
   0xa   : > { %s34_s17 = sadd.s32 1, %s1175_s13  ;;  %s31_s18 = ssub.s32 %s1179_s14, %s1263_s16 }
   0xb   : > { %p41_p0 = scmp.ne.s32.totalorder %s1175_s13, %s1171_s12  ;;  %p32_p1 = scmp.eq.s32.totalorder %s31_s18, 0 }
   0xc   : > { %p42_p2 = scmp.eq.s32.totalorder %s1179_s14, 0  ;;  %p47_p3 = scmp.ne.s32.totalorder %s1171_s12, %s1167_s11 }
   0xd   : > { %p48_p4 = scmp.eq.s32.totalorder %s1259_s8, 0  ;;  %p239_p7 = scmp.eq.s32.totalorder %s1259_s8, 1 }
   0xe   : > { %s1275_s19 = scalar_select %p32_p1, %s1175_s13, %s34_s17  }
   0xf   : > { %p1277_p5 = por %p42_p2, %p41_p0  ;;  %p1281_p6 = por %p48_p4, %p47_p3 }
  0x10   : > { %1443 = sst [smem:[#allocation10_spill]] %s1275_s19  ;;  %p245_p8 = scmp.eq.s32.totalorder %s936_s15, 1 }
  0x11   : > { %p938_p9 = scmp.ge.s32.totalorder %s1179_s14, 2  ;;  %p994_p10 = scmp.lt.s32.totalorder %s1179_s14, 2 }
  0x12   : > { %p1288_p11 = por %p239_p7, %p41_p0  ;;  %p1292_p12 = por %p245_p8, %p47_p3 }
  0x13   : > { %s289_s24 = sand.u32 1, %s1175_s13   ;;  %s981_s25 = sshll.u32 %s1179_s14, 5 }
  0x14   : > { %s939_s26 = sshll.u32 %s289_s24, 6  ;;  %s298_s29 = scalar_lea.hbm %s1431_s0, %s981_s25 }
  0x15   : > { %s299_s30 = sshll.u32 %s298_s29, 4  ;;  %s293_s10 = scalar_lea.vmem [#allocation3], %s939_s26  ;;  %s300_s30 = int_to_ptr.hbm [resolvable:$true] %s299_s30 }
  0x16   : > { %s301_s15 = sshll.u32 %s293_s10, 4  ;;  %p1303_p13 = pnand %p994_p10, %p1277_p5  ;;  %s302_s15 = int_to_ptr.vmem [resolvable:$true] %s301_s15 }
  0x17   : > { %p942_p0 = scmp.ge.s32.totalorder %s1179_s14, 1  ;;  %s290_s18 = scalar_lea.sflag [#allocation4], %s289_s24 }
  0x18   : > { %s1083_s19 = sshra.s32 %s300_s30, 4  ;;  %p1087_p2 = pneg %p1303_p13  ;;  %s1084_s19 = int_to_ptr.hbm [resolvable:$true] %s1083_s19 }
  0x19   : > { %s1085_s13 = scalar_lea.hbm %s1084_s19, 64  ;;  %s1090_s27 = scalar_lea.hbm %s1431_s0, 128 }
  0x1a   : > { %p1086_p1 = scmp.ne.s32.totalorder %s1084_s19, %s1085_s13  ;;  %p1091_p5 = scmp.lt.s32.totalorder %s1084_s19, %s1431_s0 }
  0x1b   : > { %p1092_p7 = scmp.lt.s32.totalorder %s1090_s27, %s1085_s13 }
  0x1c   : > { %p1088_p3 = pnand %p1087_p2, %p1086_p1 }
  0x1d   : > { %p1093_p8 = por %p1092_p7, %p1091_p5 }
  0x1e   : > { %p1089_p4 = pneg %p1088_p3 }
  0x20   : > { %p1094_p10 = pnand %p1093_p8, %p1089_p4 }
  0x22   : > { %1097 = shalt.err (!%p1094_p10)
}
  0x23   : > { %s1181_s24 = smov 1024   ;;  %s1182_s29 = smov 512  }
  0x24   : > { %s1183_s10 = smov 32   ;;  %p309_p1 = scmp.lt.s32.totalorder %s1179_s14, 3 }
  0x25   : > { %989 = dma.hbm_to_vmem [thread:$0]  (!%p1303_p13), %s300_s30, 1024, %s302_s15, %s290_s18, %s1181_s24, %s1182_s29, %s1183_s10  }
  0x26   : > { %p310_p2 = pnand %p942_p0, %p309_p1 }
  0x27   : > { %s1322_s25 = sand.u32 (!%p310_p2), 1, %s1171_s12  }
  0x28   : > { %313 = sbr.rel (%p310_p2) target bundleno = 651 (0x28b), region = 56  ;;  %s943_s13 = sshll.u32 (!%p310_p2), %s1322_s25, 6 }
  0x29   : > { %s316_s19 = scalar_lea.sflag (!%p310_p2), [#allocation4], %s1322_s25  ;;  %s319_s26 = scalar_lea.vmem (!%p310_p2), [#allocation3], %s943_s13 }
  0x2d   : > { %1158 = dma.done.wait (%p1281_p6), %s316_s19, 1024  }
  0x2e   : > { %1160 = vsyncadd (%p1281_p6), %s316_s19, 4294966272  ;;  %v1184_v1 = vmov 0   ;;  %vm386_vm0 = vcmask 1043456   ;;  %v361_v2 = vld [vmem:[%s319_s26 + $0x20] sm:$0xf]  ;;  %v358_v7 = vld [vmem:[%s319_s26 + $0x8] sm:$0xff] }
  0x2f   : > { %1032 = vset.pattern.permute.xlu0 %v1184_v1  ;;  %1033 = vset.pattern.permute.xlu1 %v1184_v1  ;;  %v362_v3 = vld [vmem:[%s319_s26 + $0x28] sm:$0xf]  ;;  %v363_v4 = vld [vmem:[%s319_s26 + $0x30] sm:$0xf]  ;;  %v364_v5 = vld [vmem:[%s319_s26 + $0x38] sm:$0xf] }
  0x30   : > { %1034 = vset.pattern.permute.xlu2 %v1184_v1  ;;  %945 = vmatpush.msk.msra.mxu0 %vm386_vm0, %v361_v2  ;;  %v357_v6 = vld [vmem:[%s319_s26] sm:$0xff]  ;;  %v359_v8 = vld [vmem:[%s319_s26 + $0x10] sm:$0xff]  ;;  %v360_v9 = vld [vmem:[%s319_s26 + $0x18] sm:$0xff]  ;;  %vm379_vm1 = vcmask 97280   ;;  %vm513_vm2 = vcmask 130048   ;;  %s944_s19 = sshll.u32 %s1322_s25, 2 }
  0x31   : > { %948 = vmatpush.msk.msra.mxu1 %vm386_vm0, %v362_v3  ;;  %951 = vmatpush.msk.msra.mxu2 %vm386_vm0, %v363_v4  ;;  %v365_v10 = vld [vmem:[%s1432_s1] sm:$0xff]  ;;  %v368_v11 = vld [vmem:[%s1433_s2 + $0x8] sm:$0xff]  ;;  %s978_s26 = sshll.u32 %s1259_s8, 2  ;;  %vm838_vm3 = vcmask 1040384   ;;  %vm840_vm4 = vcmask 1042434   ;;  %s354_s17 = scalar_lea.vmem [#allocation6], %s944_s19 }
  0x32   : > { %954 = vmatpush.msk.msra.mxu3 %vm386_vm0, %v364_v5  ;;  %414 = vmatpush.msra.mxu0 %v357_v6  ;;  %v366_v12 = vld [vmem:[%s1432_s1 + $0x8] sm:$0xff]  ;;  %v367_v13 = vld [vmem:[%s1433_s2] sm:$0xff]  ;;  %s861_s15 = scalar_lea.hbm %s1440_s9, %s978_s26  ;;  %s863_s18 = sshll.u32 %s354_s17, 4  ;;  %vm842_vm5 = vcmask 1041408   ;;  %s864_s18 = int_to_ptr.vmem [resolvable:$true] %s863_s18 }
  0x33   : > { %437 = vmatpush.msra.mxu1 %v358_v7  ;;  %460 = vmatpush.msra.mxu2 %v359_v8  ;;  %v741_v14 = vld [vmem:[#allocation2] sm:$0x1]  ;;  %v502_v16 = vld [vmem:[%s1435_s4 + $0x8] sm:$0xff]  ;;  %s865_s27 = sshll.u32 %s861_s15, 4  ;;  %s851_s8 = scalar_lea.sflag [#allocation5], %s1322_s25  ;;  %s866_s27 = int_to_ptr.hbm [resolvable:$true] %s865_s27 }
  0x34   : > { %483 = vmatpush.msra.mxu3 %v360_v9  ;;  %946 = vmatmul.msk.f32.vlgmr.msra.gmra.mxu0 %vm379_vm1, %v365_v10  ;;  %v501_v19 = vld [vmem:[%s1435_s4] sm:$0xff]  ;;  %v500_v44 = vld [vmem:[%s1434_s3 + $0x8] sm:$0xff]  ;;  %s1127_s20 = sshra.s32 %s866_s27, 4  ;;  %s1133_s10 = scalar_lea.hbm %s1440_s9, 8  ;;  %s1128_s20 = int_to_ptr.hbm [resolvable:$true] %s1127_s20 }
  0x35   : > { %949 = vmatmul.msk.f32.vlgmr.msra.gmra.mxu1 %vm379_vm1, %v365_v10  ;;  %952 = vmatmul.msk.f32.vlgmr.msra.gmra.mxu2 %vm379_vm1, %v365_v10  ;;  %v499_v37 = vld [vmem:[%s1434_s3] sm:$0xff]  ;;  %v623_v55 = vld [vmem:[%s1437_s6 + $0x8] sm:$0xff]  ;;  %s1129_s28 = scalar_lea.hbm %s1128_s20, 4  ;;  %p1134_p3 = scmp.lt.s32.totalorder %s1128_s20, %s1440_s9 }
  0x36   : > { %955 = vmatmul.msk.f32.vlgmr.msra.gmra.mxu3 %vm379_vm1, %v365_v10  ;;  %376 = vperm.xlu0 %1032, %v368_v11   ;;  %v622_v60 = vld [vmem:[%s1437_s6] sm:$0xff]  ;;  %v621_v6 = vld [vmem:[%s1436_s5 + $0x8] sm:$0xff]  ;;  %p1130_p6 = scmp.ne.s32.totalorder %s1128_s20, %s1129_s28  ;;  %p1135_p4 = scmp.lt.s32.totalorder %s1133_s10, %s1129_s28 }
  0x37   : > { %510 = vperm.xlu1 %1033, %v502_v16   ;;  %631 = vperm.xlu2 %1034, %v623_v55   ;;  %v620_v63 = vld [vmem:[%s1436_s5] sm:$0xff] }
  0x38   : > { %p1131_p13 = pnand %p1130_p6, %p1288_p11  ;;  %p1136_p5 = por %p1135_p4, %p1134_p3 }
  0x3a   : > { %p1132_p0 = pneg %p1131_p13 }
  0x3c   : > { %947 = vmatmul.msk.f32.gmra.mxu0 %vm379_vm1, %v366_v12  ;;  %p1137_p7 = pnand %p1136_p5, %p1132_p0 }
  0x3d   : > { %950 = vmatmul.msk.f32.gmra.mxu1 %vm379_vm1, %v366_v12  ;;  %953 = vmatmul.msk.f32.gmra.mxu2 %vm379_vm1, %v366_v12 }
  0x3e   : > { %956 = vmatmul.msk.f32.gmra.mxu3 %vm379_vm1, %v366_v12  ;;  %371 = vperm.xlu0 %1032, %v367_v13  }
  0x3f   : > { %505 = vperm.xlu1 %1033, %v501_v19   ;;  %626 = vperm.xlu2 %1034, %v622_v60  }
  0x46   : > { %744 = vperm.xlu0 %1032, %v741_v14  }
  0x91   : > { %v632_v11 = vpop.permute.xlu2 %631 }
  0x99   : > { %v627_v14 = vpop.permute.xlu2 %626 }
  0xa8   : > { %v377_v15 = vpop.permute.xlu0 %376 }
  0xa9   : > { %v511_v45 = vpop.permute.xlu1 %510 }
  0xb0   : > { %v372_v23 = vpop.permute.xlu0 %371 }
  0xb1   : > { %v416_v17 = vpop.f32.mrf.mxu0  ;;  %v506_v48 = vpop.permute.xlu1 %505 }
  0xb2   : > { %v439_v18 = vpop.f32.mrf.mxu1  ;;  %v417_v26 = vadd.f32 %v416_v17, %v372_v23 }
  0xb3   : > { %v440_v28 = vadd.f32 %v439_v18, %v372_v23 }
  0xb8   : > { %v462_v20 = vpop.f32.mrf.mxu2 }
  0xb9   : > { %v485_v21 = vpop.f32.mrf.mxu3  ;;  %v419_v22 = vpop.f32.mrf.mxu0  ;;  %v463_v31 = vadd.f32 %v462_v20, %v372_v23 }
  0xba   : > { %v420_v24 = vadd.f32 %v419_v22, %v377_v15  ;;  %v442_v25 = vpop.f32.mrf.mxu1  ;;  %v486_v34 = vadd.f32 %v485_v21, %v372_v23 }
  0xbb   : > { %v443_v27 = vadd.f32 %v442_v25, %v377_v15 }
  0xbc   : > { %1035 = vtanh.f32 %v420_v24 }
  0xbd   : > { %1037 = vtanh.f32 %v443_v27 }
  0xbe   : > { %1039 = vtanh.f32 %v417_v26  ;;  %v740_v26 = vld [vmem:[%s1438_s7] sm:$0x1] }
  0xbf   : > { %1041 = vtanh.f32 %v440_v28 }
  0xc0   : > { %v465_v29 = vpop.f32.mrf.mxu2 }
  0xc1   : > { %v488_v30 = vpop.f32.mrf.mxu3  ;;  %v466_v32 = vadd.f32 %v465_v29, %v377_v15 }
  0xc2   : > { %v489_v33 = vadd.f32 %v488_v30, %v377_v15  ;;  %v1036_v35 = vpop.eup %1035 }
  0xc3   : > { %1043 = vtanh.f32 %v466_v32  ;;  %v1038_v36 = vpop.eup %1037  ;;  %534 = vmatpush.msrb.mxu0 %v1036_v35 }
  0xc4   : > { %1045 = vtanh.f32 %v489_v33  ;;  %v1040_v38 = vpop.eup %1039  ;;  %557 = vmatpush.msrb.mxu1 %v1038_v36 }
  0xc5   : > { %1047 = vtanh.f32 %v463_v31  ;;  %v1042_v39 = vpop.eup %1041  ;;  %535 = vmatpush.msrb.mxu0 %v1040_v38  ;;  %v745_v38 = vpop.permute.xlu0 %744 }
  0xc6   : > { %1049 = vtanh.f32 %v486_v34  ;;  %558 = vmatpush.msrb.mxu1 %v1042_v39  ;;  %957 = vmatmul.msk.f32.vlgmr.msrb.gmra.mxu0 %vm513_vm2, %v499_v37 }
  0xc7   : > { %959 = vmatmul.msk.f32.vlgmr.msrb.gmra.mxu1 %vm513_vm2, %v499_v37 }
  0xc9   : > { %v1044_v40 = vpop.eup %1043 }
  0xca   : > { %v1046_v41 = vpop.eup %1045  ;;  %580 = vmatpush.msrb.mxu2 %v1044_v40  ;;  %v747_v40 = vperm.slane %v745_v38, 0 }
  0xcb   : > { %v1048_v42 = vpop.eup %1047  ;;  %603 = vmatpush.msrb.mxu3 %v1046_v41 }
  0xcc   : > { %v1050_v43 = vpop.eup %1049  ;;  %581 = vmatpush.msrb.mxu2 %v1048_v42 }
  0xcd   : > { %604 = vmatpush.msrb.mxu3 %v1050_v43  ;;  %961 = vmatmul.msk.f32.vlgmr.msrb.gmra.mxu2 %vm513_vm2, %v499_v37 }
  0xce   : > { %963 = vmatmul.msk.f32.vlgmr.msrb.gmra.mxu3 %vm513_vm2, %v499_v37  ;;  %958 = vmatmul.msk.f32.gmra.mxu0 %vm513_vm2, %v500_v44 }
  0xcf   : > { %960 = vmatmul.msk.f32.gmra.mxu1 %vm513_vm2, %v500_v44 }
  0xd5   : > { %962 = vmatmul.msk.f32.gmra.mxu2 %vm513_vm2, %v500_v44 }
  0xd6   : > { %964 = vmatmul.msk.f32.gmra.mxu3 %vm513_vm2, %v500_v44 }
 0x143   : > { %v537_v46 = vpop.f32.mrf.mxu0 }
 0x144   : > { %v560_v47 = vpop.f32.mrf.mxu1  ;;  %v538_v49 = vadd.f32 %v537_v46, %v506_v48  ;;  %v845_v46 = vlaneseq }
 0x145   : > { %v561_v50 = vadd.f32 %v560_v47, %v506_v48 }
 0x146   : > { %1051 = vtanh.f32 %v538_v49  ;;  %vm847_vm6 = vcmp.lt.s32.totalorder %v845_v46, 512 }
 0x147   : > { %1053 = vtanh.f32 %v561_v50 }
 0x14b   : > { %v540_v51 = vpop.f32.mrf.mxu0 }
 0x14c   : > { %v541_v52 = vadd.f32 %v540_v51, %v511_v45  ;;  %v563_v53 = vpop.f32.mrf.mxu1  ;;  %v1052_v58 = vpop.eup %1051 }
 0x14d   : > { %v564_v54 = vadd.f32 %v563_v53, %v511_v45  ;;  %v1054_v59 = vpop.eup %1053 }
 0x14e   : > { %1055 = vtanh.f32 %v541_v52 }
 0x14f   : > { %1057 = vtanh.f32 %v564_v54 }
 0x150   : > { %v583_v56 = vpop.f32.mrf.mxu2 }
 0x151   : > { %v606_v57 = vpop.f32.mrf.mxu3  ;;  %v584_v1 = vadd.f32 %v583_v56, %v506_v48 }
 0x152   : > { %v607_v4 = vadd.f32 %v606_v57, %v506_v48 }
 0x154   : > { %v1056_v61 = vpop.eup %1055 }
 0x155   : > { %v1058_v62 = vpop.eup %1057  ;;  %654 = vmatpush.msra.mxu0 %v1056_v61 }
 0x156   : > { %677 = vmatpush.msra.mxu1 %v1058_v62 }
 0x157   : > { %655 = vmatpush.msra.mxu0 %v1052_v58 }
 0x158   : > { %v586_v0 = vpop.f32.mrf.mxu2  ;;  %678 = vmatpush.msra.mxu1 %v1054_v59  ;;  %965 = vmatmul.msk.f32.vlgmr.msra.gmra.mxu0 %vm513_vm2, %v620_v63 }
 0x159   : > { %v587_v2 = vadd.f32 %v586_v0, %v511_v45  ;;  %v609_v3 = vpop.f32.mrf.mxu3  ;;  %967 = vmatmul.msk.f32.vlgmr.msra.gmra.mxu1 %vm513_vm2, %v620_v63 }
 0x15a   : > { %v610_v5 = vadd.f32 %v609_v3, %v511_v45 }
 0x15b   : > { %1059 = vtanh.f32 %v587_v2 }
 0x15c   : > { %1061 = vtanh.f32 %v610_v5 }
 0x15d   : > { %1063 = vtanh.f32 %v584_v1 }
 0x15e   : > { %1065 = vtanh.f32 %v607_v4 }
 0x160   : > { %966 = vmatmul.msk.f32.gmra.mxu0 %vm513_vm2, %v621_v6 }
 0x161   : > { %v1060_v7 = vpop.eup %1059  ;;  %968 = vmatmul.msk.f32.gmra.mxu1 %vm513_vm2, %v621_v6 }
 0x162   : > { %v1062_v8 = vpop.eup %1061  ;;  %700 = vmatpush.msra.mxu2 %v1060_v7 }
 0x163   : > { %v1064_v9 = vpop.eup %1063  ;;  %723 = vmatpush.msra.mxu3 %v1062_v8 }
 0x164   : > { %v1066_v10 = vpop.eup %1065  ;;  %701 = vmatpush.msra.mxu2 %v1064_v9 }
 0x165   : > { %724 = vmatpush.msra.mxu3 %v1066_v10  ;;  %969 = vmatmul.msk.f32.vlgmr.msra.gmra.mxu2 %vm513_vm2, %v620_v63 }
 0x166   : > { %971 = vmatmul.msk.f32.vlgmr.msra.gmra.mxu3 %vm513_vm2, %v620_v63 }
 0x16d   : > { %970 = vmatmul.msk.f32.gmra.mxu2 %vm513_vm2, %v621_v6 }
 0x16e   : > { %972 = vmatmul.msk.f32.gmra.mxu3 %vm513_vm2, %v621_v6 }
 0x1d5   : > { %v657_v12 = vpop.f32.mrf.mxu0 }
 0x1d6   : > { %v680_v13 = vpop.f32.mrf.mxu1  ;;  %v658_v15 = vadd.f32 %v657_v12, %v627_v14 }
 0x1d7   : > { %v681_v16 = vadd.f32 %v680_v13, %v627_v14 }
 0x1d8   : > { %1067 = vtanh.f32 %v658_v15 }
 0x1d9   : > { %1069 = vtanh.f32 %v681_v16 }
 0x1dd   : > { %v660_v17 = vpop.f32.mrf.mxu0 }
 0x1de   : > { %v661_v18 = vadd.f32 %v660_v17, %v632_v11  ;;  %v683_v19 = vpop.f32.mrf.mxu1  ;;  %v1068_v21 = vpop.eup %1067 }
 0x1df   : > { %v684_v20 = vadd.f32 %v683_v19, %v632_v11  ;;  %v1070_v22 = vpop.eup %1069 }
 0x1e0   : > { %1071 = vtanh.f32 %v661_v18 }
 0x1e1   : > { %1073 = vtanh.f32 %v684_v20 }
 0x1e6   : > { %v1072_v23 = vpop.eup %1071 }
 0x1e7   : > { %v1074_v24 = vpop.eup %1073  ;;  %765 = vmatpush.msrb.mxu0 %v1072_v23 }
 0x1e8   : > { %v703_v25 = vpop.f32.mrf.mxu2  ;;  %785 = vmatpush.msrb.mxu1 %v1074_v24 }
 0x1e9   : > { %v726_v27 = vpop.f32.mrf.mxu3  ;;  %766 = vmatpush.msrb.mxu0 %v1068_v21  ;;  %v704_v29 = vadd.f32 %v703_v25, %v627_v14 }
 0x1ea   : > { %786 = vmatpush.msrb.mxu1 %v1070_v22  ;;  %973 = vmatmul.msk.f32.vlgmr.msrb.gmra.mxu0 %vm513_vm2, %v740_v26  ;;  %v727_v32 = vadd.f32 %v726_v27, %v627_v14 }
 0x1eb   : > { %974 = vmatmul.msk.f32.vlgmr.msrb.gmra.mxu1 %vm513_vm2, %v740_v26 }
 0x1f0   : > { %v706_v28 = vpop.f32.mrf.mxu2 }
 0x1f1   : > { %v707_v30 = vadd.f32 %v706_v28, %v632_v11  ;;  %v729_v31 = vpop.f32.mrf.mxu3 }
 0x1f2   : > { %v730_v33 = vadd.f32 %v729_v31, %v632_v11 }
 0x1f3   : > { %1075 = vtanh.f32 %v707_v30 }
 0x1f4   : > { %1077 = vtanh.f32 %v730_v33 }
 0x1f5   : > { %1079 = vtanh.f32 %v704_v29 }
 0x1f6   : > { %1081 = vtanh.f32 %v727_v32 }
 0x1f9   : > { %v1076_v34 = vpop.eup %1075 }
 0x1fa   : > { %v1078_v35 = vpop.eup %1077  ;;  %805 = vmatpush.msrb.mxu2 %v1076_v34 }
 0x1fb   : > { %v1080_v36 = vpop.eup %1079  ;;  %825 = vmatpush.msrb.mxu3 %v1078_v35 }
 0x1fc   : > { %v1082_v37 = vpop.eup %1081  ;;  %806 = vmatpush.msrb.mxu2 %v1080_v36 }
 0x1fd   : > { %826 = vmatpush.msrb.mxu3 %v1082_v37  ;;  %975 = vmatmul.msk.f32.vlgmr.msrb.gmra.mxu2 %vm513_vm2, %v740_v26 }
 0x1fe   : > { %976 = vmatmul.msk.f32.vlgmr.msrb.gmra.mxu3 %vm513_vm2, %v740_v26 }
 0x267   : > { %v768_v43 = vpop.f32.mrf.mxu0 }
 0x268   : > { %v788_v39 = vpop.f32.mrf.mxu1  ;;  %v769_v50 = vadd.f32 %v768_v43, %v747_v40 }
 0x269   : > { %v789_v41 = vadd.f32 %v788_v39, %v747_v40 }
 0x26b   : > { %v835_v47 = vrot.slane %v789_v41, 7 }
 0x26d   : > { %v839_v52 = vsel %vm838_vm3, %v769_v50, %v835_v47 }
 0x280   : > { %v808_v42 = vpop.f32.mrf.mxu2 }
 0x281   : > { %v809_v44 = vadd.f32 %v808_v42, %v747_v40  ;;  %v828_v45 = vpop.f32.mrf.mxu3 }
 0x282   : > { %v829_v48 = vadd.f32 %v828_v45, %v747_v40 }
 0x283   : > { %v836_v49 = vrot.slane %v809_v44, 6 }
 0x284   : > { %v837_v51 = vrot.slane %v829_v48, 5 }
 0x286   : > { %v841_v53 = vsel %vm840_vm4, %v836_v49, %v837_v51 }
 0x287   : > { %v843_v54 = vsel %vm842_vm5, %v839_v52, %v841_v53 }
 0x288   : > { %849 = vst.msk [vmem:[%s354_s17] sm:$0xf] %vm847_vm6, %v843_v54 }
 0x289   : > { %1140 = shalt.err (!%p1137_p7)
}
 0x28a   : > { %984 = dma.vmem_to_hbm [thread:$0]  (%p1288_p11), %s864_s18, 64, %s866_s27, %s851_s8  }
 0x28b PF: > { %s877_s25 = sand.u32 1, %s1167_s11   ;;  %p991_p8 = pnand %p938_p9, %p1292_p12 }
 0x28c   : > { %s878_s26 = scalar_lea.sflag [#allocation5], %s877_s25 }
 0x28d   : > { %p992_p10 = pneg %p991_p8 }
 0x28f   : > { %1162 = dma.done.wait (%p992_p10), %s878_s26, 64  }
 0x290   : > { %1164 = vsyncadd (%p992_p10), %s878_s26, 4294967232  ;;  %s1449_s30 = sld [smem:[#allocation9_spill]]  ;;  %p24_p1 = scmp.ge.s32.totalorder %s1263_s16, 4  }
 0x291   : > { %s1450_s13 = sld [smem:[#allocation10_spill]]  ;;  %s1451_s11 = smov %s1171_s12 }
 0x292   : > { %s1453_s14 = smov %s1263_s16  ;;  %26 = sbr.rel (!%p24_p1) target bundleno = 8 (0x8), region = 101 }
 0x296   : > { %s1452_s12 = smov %s1449_s30 }
 0x297   :  { %884 = vsyncpa [#allocation4], 1 }
 0x298   :  { %886 = vsyncpa [#allocation4 + $0x1], 1 }
 0x299   :  { %887 = vsyncpa [#allocation5], 1 }
 0x29a   :  { %889 = vsyncpa [#allocation5 + $0x1], 1 }

</bundles_post_ra>
